<compile_context>
chip_gen: v7x
topology: tpu7x:2x2x1
jax: 0.10.0
libtpu: 0.0.40
codegen_flags: <defaults>
</compile_context>

<pallas_src>
from typing import NamedTuple, Optional

import jax
import jax.numpy as jnp
from jax.experimental import pallas as pl
from jax.experimental.pallas import tpu as pltpu


def _round_up(n, m):
    return ((n + m - 1) // m) * m


# ---------------- kernels ----------------

def _resblock_proj_kernel(x_ref, wcat_ref, b1_ref, w2_ref, bsum_ref, o_ref):
    """Projection shortcut. wcat = [W1 | Ws] of shape (K, 2N); bsum = b2 + b_shortcut."""
    x = x_ref[...]
    N = w2_ref.shape[0]

    # Single MXU pass over the x tile covers both fc1 and the shortcut projection.
    t = jnp.dot(x, wcat_ref[...], preferred_element_type=jnp.float32)   # (tb, 2N)
    h = jnp.maximum(t[:, :N] + b1_ref[...], 0.0)                        # fc1 + ReLU
    residual = t[:, N:]                                                 # shortcut (bias folded)

    # dropout(p=0.3): identity in eval mode.
    # TODO(synk): training-mode dropout (stochastic mask via pltpu.prng_random_bits) not implemented.

    y = jnp.dot(h.astype(w2_ref.dtype), w2_ref[...], preferred_element_type=jnp.float32)
    o_ref[...] = jnp.maximum(y + residual + bsum_ref[...], 0.0).astype(o_ref.dtype)


def _resblock_id_kernel(x_ref, w1_ref, b1_ref, w2_ref, b2_ref, o_ref):
    """Identity shortcut (in_features == out_features): residual = x, no shortcut matmul."""
    x = x_ref[...]
    h = jnp.maximum(
        jnp.dot(x, w1_ref[...], preferred_element_type=jnp.float32) + b1_ref[...], 0.0)

    # dropout: identity in eval mode (see TODO above)

    y = jnp.dot(h.astype(w2_ref.dtype), w2_ref[...], preferred_element_type=jnp.float32)
    o_ref[...] = jnp.maximum(y + x.astype(jnp.float32) + b2_ref[...], 0.0).astype(o_ref.dtype)


# ---------------- one-time parameter prep ----------------

class ResBlockParams(NamedTuple):
    in_f: int
    out_f: int
    K: int               # padded in_features  (multiple of 128)
    N: int               # padded out_features (multiple of 128)
    identity: bool
    w_main: jnp.ndarray  # (K, 2N) = [W1 | Ws] for projection, (K, N) = W1 for identity
    w2: jnp.ndarray      # (N, N)
    b1: jnp.ndarray      # (1, N) f32
    b2sum: jnp.ndarray   # (1, N) f32  (b2, with shortcut bias folded in for projection)


def prepare_params(w1, b1, w2, b2, ws=None, bs=None, *, compute_dtype=jnp.float32):
    """One-time prep: pad to lane/sublane-friendly shapes, fold biases, and (projection
    case) concatenate W1 | Ws so the kernel needs only one x-LHS matmul.

    Padding is skipped when shapes are already (multiples of) aligned, so no redundant
    weight-sized HBM copies happen per forward call.
    """
    in_f, out_f = w1.shape
    identity = ws is None
    if identity:
        assert in_f == out_f, "identity shortcut requires in_features == out_features"
    K = _round_up(in_f, 128)
    N = _round_up(out_f, 128)

    def pad2(a, r, c):
        a = a.astype(compute_dtype)
        if a.shape == (r, c):
            return a
        return jnp.zeros((r, c), compute_dtype).at[:a.shape[0], :a.shape[1]].set(a)

    def pad_bias(v, n):
        v = v.reshape(1, -1).astype(jnp.float32)
        if v.shape == (1, n):
            return v
        return jnp.zeros((1, n), jnp.float32).at[:, :v.shape[1]].set(v)

    w2p = pad2(w2, N, N)
    b1p = pad_bias(b1, N)

    if identity:
        return ResBlockParams(in_f, out_f, K, N, True,
                              pad2(w1, K, N), w2p, b1p, pad_bias(b2, N))

    wcat = jnp.concatenate([pad2(w1, K, N), pad2(ws, K, N)], axis=1)   # (K, 2N)
    bsum = b2.reshape(-1).astype(jnp.float32) + bs.reshape(-1).astype(jnp.float32)
    return ResBlockParams(in_f, out_f, K, N, False, wcat, w2p, b1p, pad_bias(bsum, N))


# ---------------- wrapper ----------------

def _vmem_cap_bytes():
    # Query physical VMEM (minus headroom); fall back to a value safe on all
    # generations including v7x's 64 MiB per-TC.
    try:
        return int(pltpu.get_tpu_info().vmem_capacity_bytes) * 7 // 8
    except Exception:
        return 56 << 20


def residual_block(x, params: ResBlockParams, *, max_tile_b=128):
    """Fused ResidualBlock forward (eval mode).

    x: (B, in_features). `params` comes from prepare_params() (one-time prep).
    """
    B, in_f = x.shape
    assert in_f == params.in_f, "input feature dim does not match prepared params"
    K, N, out_f = params.K, params.N, params.out_f
    out_dtype = x.dtype
    cdt = params.w2.dtype   # compute (MXU-input) dtype chosen at prep time

    # ---- batch tiling (minimal padding, >=2 grid steps only when B is large) ----
    Bp = _round_up(max(B, 1), 8)
    if Bp <= max_tile_b:
        tile_b = Bp
        grid_b = 1
    else:
        grid_b = -(-Bp // max_tile_b)                 # cdiv
        tile_b = _round_up(-(-Bp // grid_b), 8)       # size tile to the actual batch
        Bp = tile_b * grid_b

    # ---- pad x only (weights were padded once in prepare_params) ----
    xp = x.astype(cdt)
    if xp.shape != (Bp, K):
        xp = jnp.zeros((Bp, K), cdt).at[:B, :in_f].set(xp)

    x_spec = pl.BlockSpec((tile_b, K), lambda i: (i, 0))
    out_spec = pl.BlockSpec((tile_b, N), lambda i: (i, 0))

    def _const_spec(r, c):
        # Grid-invariant block: constant index_map (no re-DMA across steps);
        # Buffered(1) halves its VMEM residency vs default double-buffering.
        return pl.BlockSpec((r, c), lambda i: (0, 0), pipeline_mode=pl.Buffered(1))

    if params.identity:
        kernel = _resblock_id_kernel
        args = (xp, params.w_main, params.b1, params.w2, params.b2sum)
        in_specs = [x_spec, _const_spec(K, N), _const_spec(1, N),
                    _const_spec(N, N), _const_spec(1, N)]
    else:
        kernel = _resblock_proj_kernel
        args = (xp, params.w_main, params.b1, params.w2, params.b2sum)
        in_specs = [x_spec, _const_spec(K, 2 * N), _const_spec(1, N),
                    _const_spec(N, N), _const_spec(1, N)]

    # ---- explicit VMEM budget: resident weights (x1) + pipelined x/out (x2) + f32 temps ----
    w_bytes = sum(int(a.size) * a.dtype.itemsize for a in args[1:])
    x_bytes = 2 * tile_b * K * jnp.dtype(cdt).itemsize
    o_bytes = 2 * tile_b * N * jnp.dtype(out_dtype).itemsize
    tmp_bytes = 6 * tile_b * N * 4            # f32 intermediates (t / h / y / residual)
    vmem_limit = min(_vmem_cap_bytes(),
                     (w_bytes + x_bytes + o_bytes + tmp_bytes) * 5 // 4 + (4 << 20))

    # TODO(synk): for very large hidden sizes where whole weights no longer fit VMEM
    # (earliest on v7x), add a K-reduction grid axis with a pl.when-initialized f32
    # accumulator and tile W2's columns instead of keeping all weights resident.

    out_padded = pl.pallas_call(
        kernel,
        out_shape=jax.ShapeDtypeStruct((Bp, N), out_dtype),
        grid_spec=pltpu.PrefetchScalarGridSpec(
            num_scalar_prefetch=0,
            grid=(grid_b,),
            in_specs=in_specs,
            out_specs=out_spec,
        ),
        compiler_params=pltpu.CompilerParams(
            dimension_semantics=("parallel",),
            vmem_limit_bytes=int(vmem_limit),
        ),
    )(*args)

    return out_padded[:B, :out_f]


# ---------------- params / reference ----------------

def make_params(key, in_features, out_features, dtype=jnp.float32):
    """Deterministic synthetic parameters (PyTorch-style uniform fan-in init)."""
    k1, k2, k3, k4, k5, k6 = jax.random.split(key, 6)
    lim1 = 1.0 / jnp.sqrt(in_features)
    lim2 = 1.0 / jnp.sqrt(out_features)
    w1 = jax.random.uniform(k1, (in_features, out_features), dtype, -lim1, lim1)
    b1 = jax.random.uniform(k2, (out_features,), dtype, -lim1, lim1)
    w2 = jax.random.uniform(k3, (out_features, out_features), dtype, -lim2, lim2)
    b2 = jax.random.uniform(k4, (out_features,), dtype, -lim2, lim2)
    if in_features != out_features:
        ws = jax.random.uniform(k5, (in_features, out_features), dtype, -lim1, lim1)
        bs = jax.random.uniform(k6, (out_features,), dtype, -lim1, lim1)
        return w1, b1, w2, b2, ws, bs
    return w1, b1, w2, b2, None, None


def reference(x, w1, b1, w2, b2, ws=None, bs=None):
    residual = x if ws is None else x @ ws + bs
    h = jnp.maximum(x @ w1 + b1, 0.0)
    y = h @ w2 + b2
    return jnp.maximum(y + residual, 0.0)


if __name__ == "__main__":
    key = jax.random.PRNGKey(0)
    kx1, kp1, kx2, kp2, kx3, kp3 = jax.random.split(key, 6)

    # Case 1: projection shortcut (in_f != out_f), f32 compute -> tight tolerance.
    B, in_f, out_f = 16, 32, 64
    x = jax.random.normal(kx1, (B, in_f), jnp.float32)
    raw1 = make_params(kp1, in_f, out_f)
    p1 = prepare_params(*raw1)                                  # one-time prep (f32)
    out = jax.block_until_ready(residual_block(x, p1))
    ref = reference(x, *raw1)
    assert out.shape == (B, out_f)
    assert jnp.allclose(out, ref, atol=1e-5, rtol=1e-5), "projection-shortcut mismatch"

    # Case 2: identity shortcut (in_f == out_f) -> residual = x, no shortcut matmul.
    B2, feat = 24, 64
    x2 = jax.random.normal(kx2, (B2, feat), jnp.float32)
    raw2 = make_params(kp2, feat, feat)
    p2 = prepare_params(*raw2)
    out2 = jax.block_until_ready(residual_block(x2, p2))
    ref2 = reference(x2, *raw2)
    assert out2.shape == (B2, feat)
    assert jnp.allclose(out2, ref2, atol=1e-5, rtol=1e-5), "identity-shortcut mismatch"

    # Case 3: B > max_tile_b -> multi-step "parallel" grid with minimal batch padding
    # (B=200 -> Bp=208, tile_b=104, grid=(2,)).
    B3, in_f3, out_f3 = 200, 64, 128
    x3 = jax.random.normal(kx3, (B3, in_f3), jnp.float32)
    raw3 = make_params(kp3, in_f3, out_f3)
    p3 = prepare_params(*raw3)
    out3 = jax.block_until_ready(residual_block(x3, p3))
    ref3 = reference(x3, *raw3)
    assert out3.shape == (B3, out_f3)
    assert jnp.allclose(out3, ref3, atol=2e-4, rtol=2e-4), "batch-tiled mismatch"

    # Case 4: bf16 MXU inputs (inference fast path), f32 accumulation -> loose tolerance.
    p1_bf16 = prepare_params(*raw1, compute_dtype=jnp.bfloat16)
    out_bf16 = jax.block_until_ready(residual_block(x, p1_bf16))
    assert out_bf16.shape == (B, out_f)
    assert jnp.allclose(out_bf16, ref, atol=5e-2, rtol=5e-2), "bf16 path mismatch"

    print("KERNEL_OK")
</pallas_src>

<mosaic_0001>
module attributes {stable_mosaic.version = 11 : i64} {
  func.func @_resblock_proj_kernel(%arg0: i32, %arg1: memref<16x128xf32, #tpu.memory_space<vmem>>, %arg2: memref<128x256xf32, #tpu.memory_space<vmem>>, %arg3: memref<1x128xf32, #tpu.memory_space<vmem>>, %arg4: memref<128x128xf32, #tpu.memory_space<vmem>>, %arg5: memref<1x128xf32, #tpu.memory_space<vmem>>, %arg6: memref<16x128xf32, #tpu.memory_space<vmem>>) attributes {dimension_semantics = [#tpu.dimension_semantics<parallel>], iteration_bounds = array<i64: 1>, scalar_prefetch = 0 : i64, scratch_operands = 0 : i64, tpu.core_type = #tpu.core_type<tc>, window_params = [{transform_indices = @transform_0, window_bounds = array<i64: 16, 128>}, {pipeline_mode = #tpu.pipeline_mode<synchronous>, transform_indices = @transform_1, window_bounds = array<i64: 128, 256>}, {pipeline_mode = #tpu.pipeline_mode<synchronous>, transform_indices = @transform_2, window_bounds = array<i64: 1, 128>}, {pipeline_mode = #tpu.pipeline_mode<synchronous>, transform_indices = @transform_3, window_bounds = array<i64: 128, 128>}, {pipeline_mode = #tpu.pipeline_mode<synchronous>, transform_indices = @transform_4, window_bounds = array<i64: 1, 128>}, {transform_indices = @transform_5, window_bounds = array<i64: 16, 128>}]} {
    %c0 = arith.constant 0 : index
    %c0_0 = arith.constant 0 : index
    %0 = vector.load %arg1[%c0, %c0_0] : memref<16x128xf32, #tpu.memory_space<vmem>>, vector<16x128xf32>
    %c0_1 = arith.constant 0 : index
    %c0_2 = arith.constant 0 : index
    %1 = vector.load %arg2[%c0_1, %c0_2] : memref<128x256xf32, #tpu.memory_space<vmem>>, vector<128x256xf32>
    %cst = arith.constant dense<0.000000e+00> : vector<16x256xf32>
    %2 = tpu.matmul %0, %1, %cst {dimension_numbers = #tpu.dot_dimension_numbers<[1], [0], [0], [1], [0, 0, 1, 1], [], []>} : vector<16x128xf32>, vector<128x256xf32>, vector<16x256xf32> -> vector<16x256xf32>
    %3 = vector.extract_strided_slice %2 {offsets = [0, 0], sizes = [16, 128], strides = [1, 1]} : vector<16x256xf32> to vector<16x128xf32>
    %c0_3 = arith.constant 0 : index
    %c0_4 = arith.constant 0 : index
    %4 = vector.load %arg3[%c0_3, %c0_4] : memref<1x128xf32, #tpu.memory_space<vmem>>, vector<1x128xf32>
    %5 = vector.broadcast %4 : vector<1x128xf32> to vector<16x128xf32>
    %6 = arith.addf %3, %5 : vector<16x128xf32>
    %cst_5 = arith.constant 0.000000e+00 : f32
    %7 = vector.broadcast %cst_5 : f32 to vector<16x128xf32>
    %8 = arith.maximumf %6, %7 : vector<16x128xf32>
    %9 = vector.extract_strided_slice %2 {offsets = [0, 128], sizes = [16, 128], strides = [1, 1]} : vector<16x256xf32> to vector<16x128xf32>
    %c0_6 = arith.constant 0 : index
    %c0_7 = arith.constant 0 : index
    %10 = vector.load %arg4[%c0_6, %c0_7] : memref<128x128xf32, #tpu.memory_space<vmem>>, vector<128x128xf32>
    %cst_8 = arith.constant dense<0.000000e+00> : vector<16x128xf32>
    %11 = tpu.matmul %8, %10, %cst_8 {dimension_numbers = #tpu.dot_dimension_numbers<[1], [0], [0], [1], [0, 0, 1, 1], [], []>} : vector<16x128xf32>, vector<128x128xf32>, vector<16x128xf32> -> vector<16x128xf32>
    %12 = arith.addf %11, %9 : vector<16x128xf32>
    %c0_9 = arith.constant 0 : index
    %c0_10 = arith.constant 0 : index
    %13 = vector.load %arg5[%c0_9, %c0_10] : memref<1x128xf32, #tpu.memory_space<vmem>>, vector<1x128xf32>
    %14 = vector.broadcast %13 : vector<1x128xf32> to vector<16x128xf32>
    %15 = arith.addf %12, %14 : vector<16x128xf32>
    %cst_11 = arith.constant 0.000000e+00 : f32
    %16 = vector.broadcast %cst_11 : f32 to vector<16x128xf32>
    %17 = arith.maximumf %15, %16 : vector<16x128xf32>
    %c0_12 = arith.constant 0 : index
    %c0_13 = arith.constant 0 : index
    %18 = vector.load %arg6[%c0_12, %c0_13] : memref<16x128xf32, #tpu.memory_space<vmem>>, vector<16x128xf32>
    tpu.vector_store %arg6[%c0_12, %c0_13], %17 {strides = array<i32>} : memref<16x128xf32, #tpu.memory_space<vmem>>, vector<16x128xf32>,
    return
  }
  func.func @transform_0(%arg0: i32) -> (i32, i32) {
    %c0_i32 = arith.constant 0 : i32
    %c0_i32_0 = arith.constant 0 : i32
    return %arg0, %c0_i32 : i32, i32
  }
  func.func @transform_1(%arg0: i32) -> (i32, i32) {
    %c0_i32 = arith.constant 0 : i32
    %c0_i32_0 = arith.constant 0 : i32
    %c0_i32_1 = arith.constant 0 : i32
    return %c0_i32, %c0_i32_0 : i32, i32
  }
  func.func @transform_2(%arg0: i32) -> (i32, i32) {
    %c0_i32 = arith.constant 0 : i32
    %c0_i32_0 = arith.constant 0 : i32
    %c0_i32_1 = arith.constant 0 : i32
    return %c0_i32, %c0_i32_0 : i32, i32
  }
  func.func @transform_3(%arg0: i32) -> (i32, i32) {
    %c0_i32 = arith.constant 0 : i32
    %c0_i32_0 = arith.constant 0 : i32
    %c0_i32_1 = arith.constant 0 : i32
    return %c0_i32, %c0_i32_0 : i32, i32
  }
  func.func @transform_4(%arg0: i32) -> (i32, i32) {
    %c0_i32 = arith.constant 0 : i32
    %c0_i32_0 = arith.constant 0 : i32
    %c0_i32_1 = arith.constant 0 : i32
    return %c0_i32, %c0_i32_0 : i32, i32
  }
  func.func @transform_5(%arg0: i32) -> (i32, i32) {
    %c0_i32 = arith.constant 0 : i32
    %c0_i32_0 = arith.constant 0 : i32
    return %arg0, %c0_i32 : i32, i32
  }
}

</mosaic_0001>

<bundles_post_ra>
// kernel: tpu_custom_call.1
= control target key start
LH: loop header
LB: loop body
LE: loop exit
PB: predicated region body
PF: predicated region fallthrough
CT: control target
= control target key end

     0   :  { %10 = vsyncpa [#allocation3], 0  ;;  %s632_s0 = inlined_call_operand.hbm [shape: f32[16,128], index: 0, kind: input, shape index: {}]   ;;  %s633_s1 = inlined_call_operand.hbm [shape: f32[128,256], index: 1, kind: input, shape index: {}]   ;;  %s634_s2 = inlined_call_operand.vmem [shape: f32[1,128], index: 2, kind: input, shape index: {}]   ;;  %s635_s3 = inlined_call_operand.hbm [shape: f32[128,128], index: 3, kind: input, shape index: {}]   ;;  %s636_s4 = inlined_call_operand.vmem [shape: f32[1,128], index: 4, kind: input, shape index: {}]   ;;  %s637_s5 = inlined_call_operand.hbm [shape: f32[16,128], index: 5, kind: output, shape index: {}]  }
   0x1   :  { %11 = vsyncpa [#allocation6], 0 }
   0x2   :  { %12 = vsyncpa [#allocation4], 0  ;;  %s528_s18 = smov [#allocation5]   ;;  %s434_s22 = scalar_lea.hbm %s633_s1, 4096 }
   0x3   :  { %s30_s19 = sshll.u32 %s528_s18, 4  ;;  %p435_p0 = scmp.ne.s32.totalorder %s633_s1, %s434_s22  ;;  %s31_s19 = int_to_ptr.vmem [resolvable:$true] %s30_s19 }
   0x4   :  { %p438_p1 = scmp.lt.u32.totalorder %s434_s22, %s633_s1 }
   0x6   :  { %p440_p2 = pnand %p438_p1, %p435_p0 }
   0x8   :  { %443 = shalt.err (!%p440_p2)
}
   0x9   :  { %s444_s27 = scalar_lea.vmem %s31_s19, 4096  ;;  %p449_p4 = scmp.lt.s32.totalorder %s31_s19, %s31_s19 }
   0xa   :  { %p445_p3 = scmp.ne.s32.totalorder %s31_s19, %s444_s27  ;;  %p450_p5 = scmp.lt.s32.totalorder %s444_s27, %s444_s27 }
   0xc   :  { %p451_p6 = por %p450_p5, %p449_p4 }
   0xe   :  { %p452_p7 = pnand %p451_p6, %p445_p3 }
  0x10   :  { %455 = shalt.err (!%p452_p7)
}
  0x11   :  { %s529_s28 = smov 256   ;;  %s530_s29 = smov 16  }
  0x12   :  { %36 = dma.hbm_to_vmem [thread:$0]  %s633_s1, 4096, %s31_s19, [#allocation6], %s529_s28, %s529_s28, %s530_s29  }
  0x13   :  { %s531_s7 = smov [#allocation2]   ;;  %s456_s11 = scalar_lea.hbm %s632_s0, 256 }
  0x14   :  { %s18_s8 = sshll.u32 %s531_s7, 4  ;;  %p457_p8 = scmp.ne.s32.totalorder %s632_s0, %s456_s11  ;;  %s19_s8 = int_to_ptr.vmem [resolvable:$true] %s18_s8 }
  0x15   :  { %p460_p9 = scmp.lt.u32.totalorder %s456_s11, %s632_s0 }
  0x17   :  { %p462_p10 = pnand %p460_p9, %p457_p8 }
  0x19   :  { %465 = shalt.err (!%p462_p10)
}
  0x1a   :  { %s466_s16 = scalar_lea.vmem %s19_s8, 256  ;;  %p471_p12 = scmp.lt.s32.totalorder %s19_s8, %s19_s8 }
  0x1b   :  { %p467_p11 = scmp.ne.s32.totalorder %s19_s8, %s466_s16  ;;  %p472_p13 = scmp.lt.s32.totalorder %s466_s16, %s466_s16 }
  0x1d   :  { %p473_p0 = por %p472_p13, %p471_p12 }
  0x1f   :  { %p474_p1 = pnand %p473_p0, %p467_p11 }
  0x21   :  { %477 = shalt.err (!%p474_p1)
}
  0x22   :  { %s532_s1 = smov 128   ;;  %s533_s17 = smov 8  }
  0x23   :  { %24 = dma.hbm_to_vmem [thread:$0]  %s632_s0, 256, %s19_s8, [#allocation3], %s532_s1, %s532_s1, %s533_s17  }
  0x24   :  { %s534_s20 = smov [#allocation7]   ;;  %s478_s24 = scalar_lea.hbm %s635_s3, 2048 }
  0x25   :  { %s44_s21 = sshll.u32 %s534_s20, 4  ;;  %p479_p2 = scmp.ne.s32.totalorder %s635_s3, %s478_s24  ;;  %s45_s21 = int_to_ptr.vmem [resolvable:$true] %s44_s21 }
  0x26   :  { %p482_p3 = scmp.lt.u32.totalorder %s478_s24, %s635_s3 }
  0x28   :  { %p484_p4 = pnand %p482_p3, %p479_p2 }
  0x2a   :  { %487 = shalt.err (!%p484_p4)
}
  0x2b   :  { %s488_s29 = scalar_lea.vmem %s45_s21, 2048  ;;  %p493_p6 = scmp.lt.s32.totalorder %s45_s21, %s45_s21 }
  0x2c   :  { %p489_p5 = scmp.ne.s32.totalorder %s45_s21, %s488_s29  ;;  %p494_p7 = scmp.lt.s32.totalorder %s488_s29, %s488_s29 }
  0x2e   :  { %p495_p8 = por %p494_p7, %p493_p6 }
  0x30   :  { %p496_p9 = pnand %p495_p8, %p489_p5 }
  0x32   :  { %499 = shalt.err (!%p496_p9)
}
  0x33   :  { %50 = dma.hbm_to_vmem [thread:$0]  %s635_s3, 2048, %s45_s21, [#allocation6], %s532_s1, %s532_s1, %s533_s17  }
  0x34   :  { %522 = dma.done.wait [#allocation3], 256  }
  0x35   :  { %523 = vsyncadd [#allocation3], 4294967040 }
  0x36   :  { %524 = dma.done.wait [#allocation6], 6144  }
  0x37   :  { %525 = vsyncadd [#allocation6], 4294961152  ;;  %v535_v0 = vmov 0.0   ;;  %v65_v1 = vld [vmem:[#allocation5 + $0x8] sm:$0xff]  ;;  %v67_v2 = vld [vmem:[#allocation5 + $0x18] sm:$0xff] }
  0x38   :  { %160 = vmatprep.mubr.f32.mxu0 %v535_v0  ;;  %v64_v3 = vld [vmem:[#allocation5] sm:$0xff]  ;;  %v361_v4 = vpack.c.bf16 %v67_v2, %v65_v1  ;;  %v66_v5 = vld [vmem:[#allocation5 + $0x10] sm:$0xff]  ;;  %v69_v6 = vld [vmem:[#allocation5 + $0x28] sm:$0xff] }
  0x39   :  { %v71_v7 = vld [vmem:[#allocation5 + $0x38] sm:$0xff]  ;;  %v363_v8 = vpack.c.bf16 %v66_v5, %v64_v3  ;;  %v68_v10 = vld [vmem:[#allocation5 + $0x20] sm:$0xff]  ;;  %v70_v11 = vld [vmem:[#allocation5 + $0x30] sm:$0xff] }
  0x3a   :  { %v365_v9 = vpack.c.bf16 %v71_v7, %v69_v6  ;;  %v73_v12 = vld [vmem:[#allocation5 + $0x48] sm:$0xff]  ;;  %362 = vmatprep.subr.bf16.mxu0 %v361_v4  ;;  %v75_v13 = vld [vmem:[#allocation5 + $0x58] sm:$0xff]  ;;  %v367_v14 = vpack.c.bf16 %v70_v11, %v68_v10  ;;  %v72_v16 = vld [vmem:[#allocation5 + $0x40] sm:$0xff] }
  0x3b   :  { %364 = vmatpush1.bf16.msra.mxu0 %v363_v8  ;;  %v369_v15 = vpack.c.bf16 %v75_v13, %v73_v12  ;;  %v74_v17 = vld [vmem:[#allocation5 + $0x50] sm:$0xff]  ;;  %v77_v18 = vld [vmem:[#allocation5 + $0x68] sm:$0xff]  ;;  %v79_v19 = vld [vmem:[#allocation5 + $0x78] sm:$0xff] }
  0x3c   :  { %366 = vmatprep.subr.bf16.mxu0 %v365_v9  ;;  %v371_v20 = vpack.c.bf16 %v74_v17, %v72_v16  ;;  %v373_v21 = vpack.c.bf16 %v79_v19, %v77_v18  ;;  %v76_v22 = vld [vmem:[#allocation5 + $0x60] sm:$0xff]  ;;  %v78_v23 = vld [vmem:[#allocation5 + $0x70] sm:$0xff]  ;;  %v81_v24 = vld [vmem:[#allocation5 + $0x88] sm:$0xff] }
  0x3d   :  { %v83_v25 = vld [vmem:[#allocation5 + $0x98] sm:$0xff]  ;;  %v184_v26 = vld [vmem:[#allocation7] sm:$0xff]  ;;  %v185_v27 = vld [vmem:[#allocation7 + $0x8] sm:$0xff]  ;;  %v375_v28 = vpack.c.bf16 %v78_v23, %v76_v22 }
  0x3e   :  { %v80_v29 = vld [vmem:[#allocation5 + $0x80] sm:$0xff]  ;;  %v393_v30 = vpack.c.bf16 %v185_v27, %v184_v26  ;;  %v186_v31 = vld [vmem:[#allocation7 + $0x10] sm:$0xff]  ;;  %v187_v32 = vld [vmem:[#allocation7 + $0x18] sm:$0xff]  ;;  %v377_v33 = vpack.c.bf16 %v83_v25, %v81_v24 }
  0x3f   :  { %368 = vmatpush1.bf16.msra.mxu0 %v367_v14  ;;  %v82_v34 = vld [vmem:[#allocation5 + $0x90] sm:$0xff]  ;;  %v397_v35 = vpack.c.bf16 %v187_v32, %v186_v31  ;;  %v188_v36 = vld [vmem:[#allocation7 + $0x20] sm:$0xff]  ;;  %v189_v37 = vld [vmem:[#allocation7 + $0x28] sm:$0xff] }
  0x40   :  { %370 = vmatprep.subr.bf16.mxu0 %v369_v15  ;;  %v85_v38 = vld [vmem:[#allocation5 + $0xa8] sm:$0xff]  ;;  %v87_v39 = vld [vmem:[#allocation5 + $0xb8] sm:$0xff]  ;;  %394 = vmatprep.subr.bf16.mxu1 %v393_v30  ;;  %v379_v40 = vpack.c.bf16 %v82_v34, %v80_v29  ;;  %v84_v41 = vld [vmem:[#allocation5 + $0xa0] sm:$0xff]  ;;  %v401_v42 = vpack.c.bf16 %v189_v37, %v188_v36 }
  0x41   :  { %396 = vmatpush3.bf16.msra.mxu1 %v393_v30  ;;  %v381_v43 = vpack.c.bf16 %v87_v39, %v85_v38  ;;  %v86_v44 = vld [vmem:[#allocation5 + $0xb0] sm:$0xff]  ;;  %v191_v46 = vld [vmem:[#allocation7 + $0x38] sm:$0xff]  ;;  %v89_v47 = vld [vmem:[#allocation5 + $0xc8] sm:$0xff] }
  0x42   :  { %398 = vmatprep.subr.bf16.mxu1 %v397_v35  ;;  %v190_v45 = vld [vmem:[#allocation7 + $0x30] sm:$0xff]  ;;  %v91_v48 = vld [vmem:[#allocation5 + $0xd8] sm:$0xff]  ;;  %v383_v49 = vpack.c.bf16 %v86_v44, %v84_v41  ;;  %v88_v50 = vld [vmem:[#allocation5 + $0xc0] sm:$0xff] }
  0x43   :  { %372 = vmatpush1.bf16.msra.mxu0 %v371_v20  ;;  %v405_v51 = vpack.c.bf16 %v191_v46, %v190_v45  ;;  %v385_v52 = vpack.c.bf16 %v91_v48, %v89_v47  ;;  %v90_v53 = vld [vmem:[#allocation5 + $0xd0] sm:$0xff]  ;;  %v192_v54 = vld [vmem:[#allocation7 + $0x40] sm:$0xff]  ;;  %v193_v55 = vld [vmem:[#allocation7 + $0x48] sm:$0xff] }
  0x44   :  { %374 = vmatprep.subr.bf16.mxu0 %v373_v21  ;;  %v93_v56 = vld [vmem:[#allocation5 + $0xe8] sm:$0xff]  ;;  %v95_v57 = vld [vmem:[#allocation5 + $0xf8] sm:$0xff]  ;;  %v387_v58 = vpack.c.bf16 %v90_v53, %v88_v50  ;;  %v92_v59 = vld [vmem:[#allocation5 + $0xe0] sm:$0xff]  ;;  %v409_v60 = vpack.c.bf16 %v193_v55, %v192_v54 }
  0x45   :  { %400 = vmatpush3.bf16.msra.mxu1 %v397_v35  ;;  %v389_v61 = vpack.c.bf16 %v95_v57, %v93_v56  ;;  %v94_v62 = vld [vmem:[#allocation5 + $0xf0] sm:$0xff]  ;;  %v195_v1 = vld [vmem:[#allocation7 + $0x58] sm:$0xff]  ;;  %v196_v6 = vld [vmem:[#allocation7 + $0x60] sm:$0xff] }
  0x46   :  { %402 = vmatprep.subr.bf16.mxu1 %v401_v42  ;;  %v194_v63 = vld [vmem:[#allocation7 + $0x50] sm:$0xff]  ;;  %v391_v2 = vpack.c.bf16 %v94_v62, %v92_v59  ;;  %v63_v5 = vld [vmem:[#allocation2 + $0x8] sm:$0xff]  ;;  %v197_v7 = vld [vmem:[#allocation7 + $0x68] sm:$0xff] }
  0x47   :  { %376 = vmatpush1.bf16.msra.mxu0 %v375_v28  ;;  %v413_v3 = vpack.c.bf16 %v195_v1, %v194_v63  ;;  %v62_v4 = vld [vmem:[#allocation2] sm:$0xff]  ;;  %v417_v8 = vpack.c.bf16 %v197_v7, %v196_v6  ;;  %v199_v10 = vld [vmem:[#allocation7 + $0x78] sm:$0xff] }
  0x48   :  { %378 = vmatprep.subr.bf16.mxu0 %v377_v33  ;;  %v198_v9 = vld [vmem:[#allocation7 + $0x70] sm:$0xff] }
  0x49   :  { %404 = vmatpush3.bf16.msra.mxu1 %v401_v42  ;;  %v421_v11 = vpack.c.bf16 %v199_v10, %v198_v9  ;;  %v306_v12 = vld [vmem:[%s634_s2] ss:$0 sm:$0xff]  ;;  %s536_s2 = smov [#allocation8]  }
  0x4a   :  { %406 = vmatprep.subr.bf16.mxu1 %v405_v51  ;;  %v307_v21 = vld [vmem:[%s636_s4] ss:$0 sm:$0xff]  ;;  %s293_s9 = sshll.u32 %s536_s2, 4  ;;  %s294_s9 = int_to_ptr.vmem [resolvable:$true] %s293_s9 }
  0x4b   :  { %380 = vmatpush1.bf16.msra.mxu0 %v379_v40  ;;  %s500_s10 = scalar_lea.vmem %s294_s9, 256  ;;  %p505_p11 = scmp.lt.s32.totalorder %s294_s9, %s294_s9 }
  0x4c   :  { %382 = vmatprep.subr.bf16.mxu0 %v381_v43  ;;  %p501_p10 = scmp.ne.s32.totalorder %s294_s9, %s500_s10  ;;  %p506_p12 = scmp.lt.s32.totalorder %s500_s10, %s500_s10 }
  0x4d   :  { %408 = vmatpush3.bf16.msra.mxu1 %v405_v51 }
  0x4e   :  { %410 = vmatprep.subr.bf16.mxu1 %v409_v60  ;;  %p507_p13 = por %p506_p12, %p505_p11 }
  0x4f   :  { %384 = vmatpush1.bf16.msra.mxu0 %v383_v49 }
  0x50   :  { %386 = vmatprep.subr.bf16.mxu0 %v385_v52  ;;  %p508_p0 = pnand %p507_p13, %p501_p10 }
  0x51   :  { %412 = vmatpush3.bf16.msra.mxu1 %v409_v60 }
  0x52   :  { %414 = vmatprep.subr.bf16.mxu1 %v413_v3 }
  0x53   :  { %388 = vmatpush1.bf16.msra.mxu0 %v387_v58 }
  0x54   :  { %390 = vmatprep.subr.bf16.mxu0 %v389_v61 }
  0x55   :  { %416 = vmatpush3.bf16.msra.mxu1 %v413_v3 }
  0x56   :  { %418 = vmatprep.subr.bf16.mxu1 %v417_v8 }
  0x57   :  { %392 = vmatpush1.bf16.msra.mxu0 %v391_v2 }
  0x59   :  { %420 = vmatpush3.bf16.msra.mxu1 %v417_v8 }
  0x5a   :  { %161 = vmatmul.mubr.f32.vlgmr.msra.gmra.mrb[0].mxu0 %v62_v4  ;;  %422 = vmatprep.subr.bf16.mxu1 %v421_v11 }
  0x5b   :  { %166 = vmatprep.mubr.f32.mxu0 %v535_v0 }
  0x5d   :  { %424 = vmatpush3.bf16.msra.mxu1 %v421_v11 }
  0x5e   :  { %167 = vmatmul.mubr.f32.gmra.mrb[2].mxu0 %v63_v5 }
 0x12d   :  { %v162_v13 = vpop.f32.mrb[0].mxu0 }
 0x12e   :  { %v164_v14 = vpop.f32.mrb[1].mxu0  ;;  %v180_v15 = vadd.f32 %v306_v12, %v162_v13 }
 0x130   :  { %v182_v0 = vmax.f32 %v180_v15, 0.0 }
 0x131   :  { %v168_v16 = vpop.f32.mrb[2].mxu0 }
 0x132   :  { %v181_v17 = vadd.f32 %v306_v12, %v168_v16  ;;  %v170_v18 = vpop.f32.mrb[3].mxu0  ;;  %358 = vmatprep.mubr.f32.mxu1 %v182_v0 }
 0x134   :  { %v183_v19 = vmax.f32 %v181_v17, 0.0 }
 0x136   :  { %359 = vmatmul.mubr.f32.vlgmr.msra.gmra.mrb[0].mxu1 %v183_v19 }
 0x209   :  { %v360_v20 = vpop.f32.mrb[0].mxu1 }
 0x20a   :  { %v272_v22 = vadd.f32 %v360_v20, %v170_v18  ;;  %v266_v23 = vpop.f32.mrb[1].mxu1 }
 0x20b   :  { %v267_v24 = vadd.f32 %v266_v23, %v164_v14 }
 0x20c   :  { %v283_v25 = vadd.f32 %v307_v21, %v272_v22 }
 0x20d   :  { %v282_v26 = vadd.f32 %v307_v21, %v267_v24 }
 0x20e   :  { %v285_v27 = vmax.f32 %v283_v25, 0.0 }
 0x20f   :  { %v284_v28 = vmax.f32 %v282_v26, 0.0 }
 0x210   :  { %287 = vst [vmem:[#allocation8 + $0x8] sm:$0xff] %v285_v27 }
 0x211   :  { %286 = vst [vmem:[#allocation8] sm:$0xff] %v284_v28 }
 0x212   :  { %511 = shalt.err (!%p508_p0)
}
 0x213   :  { %s512_s12 = scalar_lea.hbm %s637_s5, 256 }
 0x214   :  { %p513_p1 = scmp.ne.s32.totalorder %s637_s5, %s512_s12  ;;  %p516_p2 = scmp.lt.u32.totalorder %s512_s12, %s637_s5 }
 0x216   :  { %p518_p3 = pnand %p516_p2, %p513_p1 }
 0x218   :  { %521 = shalt.err (!%p518_p3)
}
 0x219   :  { %299 = dma.vmem_to_hbm [thread:$0]  %s294_s9, 256, %s637_s5, [#allocation4], %s532_s1, %s532_s1, %s533_s17  }
 0x21a   :  { %526 = dma.done.wait [#allocation4], 256  }
 0x21b   :  { %527 = vsyncadd [#allocation4], 4294967040 }
 0x21c   :  { %303 = vsyncpa [#allocation3], 1 }
 0x21d   :  { %304 = vsyncpa [#allocation6], 1 }
 0x21e   :  { %305 = vsyncpa [#allocation4], 1 }

</bundles_post_ra>
